<compile_context>
chip_gen: v7x
topology: tpu7x:2x2x1
jax: 0.10.0
libtpu: 0.0.40
codegen_flags: <defaults>
</compile_context>

<pallas_src>
import jax
import jax.numpy as jnp
from jax.experimental import pallas as pl
from jax.experimental.pallas import tpu as pltpu
import numpy as np

ALPHA = 0.25   # applied uniformly to both classes, exactly as the PyTorch module does
GAMMA = 2.0    # kernel hard-codes the explicit square (q*q); asserted below


def _make_focal_kernel(D, H, H2, N, alpha):
    """Builds the kernel with static dims closed over (shapes are trace-time)."""
    scale = alpha / N  # fold ALPHA and 1/N into one post-reduction scalar

    def kernel(xT_ref, ys_ref, wpack_ref, cpack_ref, b3m_ref, out_ref):
        xT = xT_ref[...]                                   # (D, N)  bf16

        # static slices of the packed parameter buffers (views -> zero cost)
        w1T = wpack_ref[0:H, 0:D]                          # (H,  D) bf16
        w2T = wpack_ref[H:H + H2, 0:H]                     # (H2, H) bf16
        b1 = cpack_ref[0:H, :]                             # (H,  1) f32
        b2 = cpack_ref[H:H + H2, :]                        # (H2, 1) f32
        w3m = cpack_ref[H + H2:H + 2 * H2, :]              # (H2, 1) f32

        # ---- MLP (transposed): Linear -> ReLU -> Linear -> ReLU ----
        h1 = jnp.dot(w1T, xT, preferred_element_type=jnp.float32) + b1     # (H, N) f32
        h1 = jnp.maximum(h1, 0.0)
        h2 = jnp.dot(w2T, h1.astype(jnp.bfloat16),
                     preferred_element_type=jnp.float32) + b2              # (H2, N) f32
        h2 = jnp.maximum(h2, 0.0)

        # ---- collapsed 2-class head as VPU mul + sublane reduce (no MXU) ----
        # z = (w3[:,1]-w3[:,0])^T h2 + (b3[1]-b3[0])
        z = jnp.sum(h2 * w3m, axis=0, keepdims=True) + b3m_ref[0]          # (1, N) f32

        # ---- focal loss (binary softmax == sigmoid of the margin) ----
        # -log p_t = softplus(-sign*z) computed in the stable form.
        ysign = ys_ref[...]                                 # (1, N) f32, values in {-1,+1}
        u = -ysign * z
        t = jnp.exp(-jnp.abs(u))                            # EUP exp
        one_plus_t = 1.0 + t
        sp = jnp.maximum(u, 0.0) + jnp.log(one_plus_t)      # EUP log; == CE loss
        p_t = jnp.where(u >= 0.0, t, 1.0) * pl.reciprocal(one_plus_t, approx=True)
        q = 1.0 - p_t
        focal = q * q * sp                                  # gamma == 2 -> explicit square

        out_ref[0, 0] = jnp.sum(focal) * scale              # mean * alpha -> scalar

    return kernel


def focal_loss_forward(X, y, w1, b1, w2, b2, w3, b3):
    assert GAMMA == 2.0, "kernel hard-codes (1-p_t)^2; change kernel if GAMMA != 2"
    N, D = X.shape
    H = w1.shape[1]
    H2 = w2.shape[1]

    # ---- lane-dense operands ----
    xT = X.T.astype(jnp.bfloat16)                                   # (D, N)
    ysign = (2.0 * y.astype(jnp.float32) - 1.0).reshape(1, N)       # (1, N), +/-1

    # ---- packed static parameters (would be precomputed outside a hot loop) ----
    ncol = max(D, H)
    w1T = w1.T.astype(jnp.bfloat16)                                 # (H, D)
    w2T = w2.T.astype(jnp.bfloat16)                                 # (H2, H)
    if D < ncol:
        w1T = jnp.pad(w1T, ((0, 0), (0, ncol - D)))
    if H < ncol:
        w2T = jnp.pad(w2T, ((0, 0), (0, ncol - H)))
    wpack = jnp.concatenate([w1T, w2T], axis=0)                     # (H+H2, ncol) bf16

    w3m = (w3[:, 1] - w3[:, 0]).astype(jnp.float32)                 # (H2,) margin weights
    cpack = jnp.concatenate([b1.astype(jnp.float32),
                             b2.astype(jnp.float32),
                             w3m], axis=0).reshape(H + 2 * H2, 1)   # (H+2*H2, 1) f32
    b3m = (b3[1] - b3[0]).reshape(1).astype(jnp.float32)            # scalar margin bias

    # ---- advisory cost estimate for XLA scheduling ----
    flops = 2 * H * D * N + 2 * H2 * H * N + 2 * H2 * N + 10 * N
    transcendentals = 3 * N
    bytes_accessed = (xT.size * 2 + ysign.size * 4 + wpack.size * 2
                      + cpack.size * 4 + 4 + 4)
    cost = pl.CostEstimate(flops=flops, transcendentals=transcendentals,
                           bytes_accessed=bytes_accessed)

    kernel = _make_focal_kernel(D, H, H2, N, ALPHA)
    vmem = pl.BlockSpec(memory_space=pltpu.MemorySpace.VMEM)
    smem = pl.BlockSpec(memory_space=pltpu.MemorySpace.SMEM)

    out = pl.pallas_call(
        kernel,
        out_shape=jax.ShapeDtypeStruct((1, 1), jnp.float32),
        in_specs=[vmem, vmem, vmem, vmem, smem],
        out_specs=smem,
        cost_estimate=cost,
    )(xT, ysign, wpack, cpack, b3m)
    return out[0, 0]


def _linear_init(key, fan_in, fan_out):
    # mimics nn.Linear default init: U(-1/sqrt(in), 1/sqrt(in)), [in, out] layout
    kw, kb = jax.random.split(key)
    bound = 1.0 / np.sqrt(fan_in)
    w = jax.random.uniform(kw, (fan_in, fan_out), jnp.float32, -bound, bound)
    b = jax.random.uniform(kb, (fan_out,), jnp.float32, -bound, bound)
    return w, b


def reference_forward_f32(X, y, w1, b1, w2, b2, w3, b3):
    # Pure f32 reference, mirroring the PyTorch module exactly.
    h1 = jnp.maximum(X @ w1 + b1, 0.0)
    h2 = jnp.maximum(h1 @ w2 + b2, 0.0)
    logits = h2 @ w3 + b3
    log_probs = jax.nn.log_softmax(logits, axis=1)
    lp_t = jnp.take_along_axis(log_probs, y[:, None], axis=1)[:, 0]
    p_t = jnp.exp(lp_t)
    ce = -lp_t
    focal = ALPHA * (1.0 - p_t) ** GAMMA * ce
    return jnp.mean(focal)


def reference_forward_kernel_math(X, y, w1, b1, w2, b2, w3, b3):
    # Mirrors the kernel's numerics (transposed bf16 MXU matmuls, f32 margin
    # head as mul+reduce, stable softplus).  Only the approximate reciprocal
    # differs (exact divide here).
    N, D = X.shape
    xT = X.T.astype(jnp.bfloat16)
    h1 = jnp.maximum(jnp.dot(w1.T.astype(jnp.bfloat16), xT,
                             preferred_element_type=jnp.float32) + b1[:, None], 0.0)
    h2 = jnp.maximum(jnp.dot(w2.T.astype(jnp.bfloat16), h1.astype(jnp.bfloat16),
                             preferred_element_type=jnp.float32) + b2[:, None], 0.0)
    w3m = (w3[:, 1] - w3[:, 0]).astype(jnp.float32)
    b3m = (b3[1] - b3[0]).astype(jnp.float32)
    z = jnp.sum(h2 * w3m[:, None], axis=0) + b3m                      # (N,)
    sign = (2 * y - 1).astype(jnp.float32)
    u = -sign * z
    t = jnp.exp(-jnp.abs(u))
    one_plus_t = 1.0 + t
    sp = jnp.maximum(u, 0.0) + jnp.log(one_plus_t)
    p_t = jnp.where(u >= 0.0, t, 1.0) / one_plus_t
    q = 1.0 - p_t
    return jnp.sum(q * q * sp) * (ALPHA / N)


if __name__ == "__main__":
    # module hyperparameters (small, consistent with __init__ signature)
    n_samples = 128
    input_dim = 32
    hidden_dim = 32
    imbalance_ratio = 0.1
    noise_level = 0.1

    key = jax.random.PRNGKey(0)
    k_pos, k_neg, k_perm, k_l1, k_l2, k_l3 = jax.random.split(key, 6)

    # ---- synthetic imbalanced dataset (as in __init__) ----
    n_positive = int(n_samples * imbalance_ratio)
    n_negative = n_samples - n_positive
    positive_X = jnp.ones((n_positive, input_dim), jnp.float32) + \
        noise_level * jax.random.normal(k_pos, (n_positive, input_dim), jnp.float32)
    negative_X = -jnp.ones((n_negative, input_dim), jnp.float32) + \
        noise_level * jax.random.normal(k_neg, (n_negative, input_dim), jnp.float32)
    X = jnp.concatenate([positive_X, negative_X], axis=0)
    y = jnp.concatenate([jnp.ones((n_positive,), jnp.int32),
                         jnp.zeros((n_negative,), jnp.int32)], axis=0)
    perm = jax.random.permutation(k_perm, n_samples)
    X = X[perm]
    y = y[perm]

    # ---- classifier parameters (deterministic init, [in, out] layout) ----
    w1, b1 = _linear_init(k_l1, input_dim, hidden_dim)
    w2, b2 = _linear_init(k_l2, hidden_dim, hidden_dim // 2)
    w3, b3 = _linear_init(k_l3, hidden_dim // 2, 2)

    loss = focal_loss_forward(X, y, w1, b1, w2, b2, w3, b3)
    loss = jax.block_until_ready(loss)

    # Tight check: kernel vs an XLA program with the same math/precision
    # (tolerance allows only for the in-kernel approximate reciprocal).
    ref_same = reference_forward_kernel_math(X, y, w1, b1, w2, b2, w3, b3)
    np.testing.assert_allclose(np.asarray(loss), np.asarray(ref_same),
                               rtol=5e-3, atol=1e-6)

    # Semantic check: kernel vs the full-f32 two-class focal-loss reference
    # (loose tolerance only accounts for bf16 MXU operands).
    ref_f32 = reference_forward_f32(X, y, w1, b1, w2, b2, w3, b3)
    np.testing.assert_allclose(np.asarray(loss), np.asarray(ref_f32),
                               rtol=5e-2, atol=2e-3)

    print("KERNEL_OK")
</pallas_src>

<mosaic_0001>
module attributes {stable_mosaic.version = 11 : i64} {
  func.func @kernel(%arg0: memref<32x128xbf16, #tpu.memory_space<vmem>>, %arg1: memref<1x128xf32, #tpu.memory_space<vmem>>, %arg2: memref<48x32xbf16, #tpu.memory_space<vmem>>, %arg3: memref<64x1xf32, #tpu.memory_space<vmem>>, %arg4: memref<1xf32, #tpu.memory_space<smem>>, %arg5: memref<1x1xf32, #tpu.memory_space<smem>>) attributes {dimension_semantics = [], scalar_prefetch = 0 : i64, scratch_operands = 0 : i64, tpu.core_type = #tpu.core_type<tc>} {
    %c0 = arith.constant 0 : index
    %c0_0 = arith.constant 0 : index
    %0 = vector.load %arg0[%c0, %c0_0] : memref<32x128xbf16, #tpu.memory_space<vmem>>, vector<32x128xbf16>
    %c0_1 = arith.constant 0 : index
    %c0_2 = arith.constant 0 : index
    %1 = vector.load %arg2[%c0_1, %c0_2] : memref<48x32xbf16, #tpu.memory_space<vmem>>, vector<32x32xbf16>
    %c32 = arith.constant 32 : index
    %c0_3 = arith.constant 0 : index
    %2 = vector.load %arg2[%c32, %c0_3] : memref<48x32xbf16, #tpu.memory_space<vmem>>, vector<16x32xbf16>
    %c0_4 = arith.constant 0 : index
    %c0_5 = arith.constant 0 : index
    %3 = vector.load %arg3[%c0_4, %c0_5] : memref<64x1xf32, #tpu.memory_space<vmem>>, vector<32x1xf32>
    %c32_6 = arith.constant 32 : index
    %c0_7 = arith.constant 0 : index
    %4 = vector.load %arg3[%c32_6, %c0_7] : memref<64x1xf32, #tpu.memory_space<vmem>>, vector<16x1xf32>
    %c48 = arith.constant 48 : index
    %c0_8 = arith.constant 0 : index
    %5 = vector.load %arg3[%c48, %c0_8] : memref<64x1xf32, #tpu.memory_space<vmem>>, vector<16x1xf32>
    %cst = arith.constant dense<0.000000e+00> : vector<32x128xf32>
    %6 = tpu.matmul %1, %0, %cst {dimension_numbers = #tpu.dot_dimension_numbers<[1], [0], [0], [1], [0, 0, 1, 1], [], []>} : vector<32x32xbf16>, vector<32x128xbf16>, vector<32x128xf32> -> vector<32x128xf32>
    %7 = vector.broadcast %3 : vector<32x1xf32> to vector<32x128xf32>
    %8 = arith.addf %6, %7 : vector<32x128xf32>
    %cst_9 = arith.constant 0.000000e+00 : f32
    %9 = vector.broadcast %cst_9 : f32 to vector<32x128xf32>
    %10 = arith.maximumf %8, %9 : vector<32x128xf32>
    %11 = arith.truncf %10 : vector<32x128xf32> to vector<32x128xbf16>
    %cst_10 = arith.constant dense<0.000000e+00> : vector<16x128xf32>
    %12 = tpu.matmul %2, %11, %cst_10 {dimension_numbers = #tpu.dot_dimension_numbers<[1], [0], [0], [1], [0, 0, 1, 1], [], []>} : vector<16x32xbf16>, vector<32x128xbf16>, vector<16x128xf32> -> vector<16x128xf32>
    %13 = vector.broadcast %4 : vector<16x1xf32> to vector<16x128xf32>
    %14 = arith.addf %12, %13 : vector<16x128xf32>
    %cst_11 = arith.constant 0.000000e+00 : f32
    %15 = vector.broadcast %cst_11 : f32 to vector<16x128xf32>
    %16 = arith.maximumf %14, %15 : vector<16x128xf32>
    %17 = vector.broadcast %5 : vector<16x1xf32> to vector<16x128xf32>
    %18 = arith.mulf %16, %17 : vector<16x128xf32>
    %cst_12 = arith.constant dense<0.000000e+00> : vector<128xf32>
    %19 = vector.multi_reduction <add>, %18, %cst_12 [0] : vector<16x128xf32> to vector<128xf32>
    %20 = vector.shape_cast %19 : vector<128xf32> to vector<1x128xf32>
    %c0_13 = arith.constant 0 : index
    %21 = memref.load %arg4[%c0_13] : memref<1xf32, #tpu.memory_space<smem>>
    %22 = vector.broadcast %21 : f32 to vector<1x128xf32>
    %23 = arith.addf %20, %22 : vector<1x128xf32>
    %c0_14 = arith.constant 0 : index
    %c0_15 = arith.constant 0 : index
    %24 = vector.load %arg1[%c0_14, %c0_15] : memref<1x128xf32, #tpu.memory_space<vmem>>, vector<1x128xf32>
    %cst_16 = arith.constant 0.000000e+00 : f32
    %25 = vector.broadcast %cst_16 : f32 to vector<1x128xf32>
    %26 = arith.subf %25, %24 : vector<1x128xf32>
    %27 = arith.mulf %26, %23 : vector<1x128xf32>
    %28 = math.absf %27 : vector<1x128xf32>
    %cst_17 = arith.constant 0.000000e+00 : f32
    %29 = vector.broadcast %cst_17 : f32 to vector<1x128xf32>
    %30 = arith.subf %29, %28 : vector<1x128xf32>
    %31 = math.exp %30 : vector<1x128xf32>
    %cst_18 = arith.constant 1.000000e+00 : f32
    %32 = vector.broadcast %cst_18 : f32 to vector<1x128xf32>
    %33 = arith.addf %32, %31 : vector<1x128xf32>
    %cst_19 = arith.constant 0.000000e+00 : f32
    %34 = vector.broadcast %cst_19 : f32 to vector<1x128xf32>
    %35 = arith.maximumf %27, %34 : vector<1x128xf32>
    %36 = math.log %33 : vector<1x128xf32>
    %37 = arith.addf %35, %36 : vector<1x128xf32>
    %cst_20 = arith.constant 0.000000e+00 : f32
    %38 = vector.broadcast %cst_20 : f32 to vector<1x128xf32>
    %39 = arith.cmpf oge, %27, %38 : vector<1x128xf32>
    %cst_21 = arith.constant 1.000000e+00 : f32
    %40 = vector.broadcast %cst_21 : f32 to vector<1x128xf32>
    %41 = arith.select %39, %31, %40 : vector<1x128xi1>, vector<1x128xf32>
    %42 = tpu.reciprocal %33 {approx = true} : vector<1x128xf32> -> vector<1x128xf32>
    %43 = arith.mulf %41, %42 : vector<1x128xf32>
    %cst_22 = arith.constant 1.000000e+00 : f32
    %44 = vector.broadcast %cst_22 : f32 to vector<1x128xf32>
    %45 = arith.subf %44, %43 : vector<1x128xf32>
    %46 = arith.mulf %45, %45 : vector<1x128xf32>
    %47 = arith.mulf %46, %37 : vector<1x128xf32>
    %48 = vector.shape_cast %47 : vector<1x128xf32> to vector<1x1x128xf32>
    %cst_23 = arith.constant dense<0.000000e+00> : vector<1xf32>
    %49 = vector.multi_reduction <add>, %48, %cst_23 [1, 2] : vector<1x1x128xf32> to vector<1xf32>
    %50 = vector.shape_cast %49 : vector<1xf32> to vector<1x1x1xf32>
    %51 = vector.extract %50[0, 0, 0] : f32 from vector<1x1x1xf32>
    %cst_24 = arith.constant 0.001953125 : f32
    %52 = arith.mulf %51, %cst_24 : f32
    %c0_25 = arith.constant 0 : index
    %c0_26 = arith.constant 0 : index
    %53 = memref.load %arg5[%c0_25, %c0_26] : memref<1x1xf32, #tpu.memory_space<smem>>
    memref.store %52, %arg5[%c0_25, %c0_26] : memref<1x1xf32, #tpu.memory_space<smem>>
    return
  }
}

</mosaic_0001>

<bundles_post_ra>
// kernel: tpu_custom_call.1
= control target key start
LH: loop header
LB: loop body
LE: loop exit
PB: predicated region body
PF: predicated region fallthrough
CT: control target
= control target key end

     0   :  { %vm83_vm0 = vcmask 261120   ;;  %v336_v3 = vmov 0   ;;  %s430_s0 = inlined_call_operand.vmem [shape: bf16[32,128], index: 0, kind: input, shape index: {}]   ;;  %s431_s1 = inlined_call_operand.vmem [shape: f32[1,128], index: 1, kind: input, shape index: {}]   ;;  %s432_s2 = inlined_call_operand.vmem [shape: bf16[48,32], index: 2, kind: input, shape index: {}]   ;;  %s433_s3 = inlined_call_operand.vmem [shape: f32[64,1], index: 3, kind: input, shape index: {}]   ;;  %s434_s4 = inlined_call_operand.<no memory space> [shape: f32[1], index: 4, kind: input, shape index: {}]   ;;  %s435_s5 = inlined_call_operand.hbm [shape: f32[1,1], index: 5, kind: output, shape index: {}]  }
   0x1   :  { %v313_v0 = vld [vmem:[%s430_s0] sm:$0xff]   ;;  %v314_v1 = vld [vmem:[%s430_s0 + $0x8] sm:$0xff]   ;;  %311 = vset.pattern.permute.xlu0 %v336_v3  ;;  %312 = vset.pattern.permute.xlu1 %v336_v3  ;;  %v35_v5 = vld [vmem:[%s433_s3 + $0x10] sm:$0xff] }
   0x2   :  { %289 = vmatprep.subr.bf16.mxu0 %v313_v0  ;;  %v315_v2 = vld [vmem:[%s432_s2] sm:$0xff]   ;;  %v316_v6 = vld [vmem:[%s432_s2 + $0x8] sm:$0xff]   ;;  %53 = vperm.xlu1 %312, %v35_v5   ;;  %v36_v8 = vld [vmem:[%s433_s3 + $0x18] sm:$0xff] }
   0x3   :  { %290 = vmatpush3.bf16.msra.mxu0 %v313_v0  ;;  %293 = vmatprep.mubr.msk.bf16.mxu0 %vm83_vm0, %v315_v2  ;;  %v33_v4 = vld [vmem:[%s433_s3] sm:$0xff]  ;;  %v34_v7 = vld [vmem:[%s433_s3 + $0x8] sm:$0xff] }
   0x4   :  { %291 = vmatprep.subr.bf16.mxu0 %v314_v1  ;;  %43 = vperm.xlu0 %311, %v33_v4  }
   0x7   :  { %292 = vmatpush3.bf16.msra.mxu0 %v314_v1 }
   0x8   :  { %11 = vsyncpa [#allocation4], 0  ;;  %48 = vperm.xlu0 %311, %v34_v7   ;;  %58 = vperm.xlu1 %312, %v36_v8   ;;  %v37_v9 = vld [vmem:[%s433_s3 + $0x20] sm:$0xff]  ;;  %v38_v10 = vld [vmem:[%s433_s3 + $0x28] sm:$0xff]  ;;  %v337_v13 = vmov 0.0   ;;  %vm338_vm1 = vmmov 0   ;;  %v226_v54 = vstv %s434_s4 }
   0x9   :  { %v39_v11 = vld [vmem:[%s433_s3 + $0x30] sm:$0xff]  ;;  %v40_v12 = vld [vmem:[%s433_s3 + $0x38] sm:$0xff]  ;;  %297 = vmatprep.subr.bf16.mxu1 %v337_v13  ;;  %301 = vmatprep.mubr.msk.bf16.mxu1 %vm338_vm1, %v337_v13  ;;  %v228_v52 = vld [vmem:[%s431_s1] sm:$0x1]  ;;  %vm247_vm3 = vcmask 1040384   ;;  %s324_s22 = scalar_lea.hbm %s435_s5, 16 }
   0xa   :  { %294 = vmatmul.mubr.msk.bf16.vlgmr.msra.gmra.mrb[0].mxu0 %vm83_vm0, %v316_v6  ;;  %v317_v32 = vld [vmem:[%s432_s2 + $0x10] sm:$0xff]   ;;  %v229_v56 = vsub.f32 0.0, %v228_v52  ;;  %p325_p0 = scmp.ne.s32.totalorder %s435_s5, %s324_s22  ;;  %p328_p1 = scmp.lt.u32.totalorder %s324_s22, %s435_s5 }
   0xc   :  { %147 = vperm.xlu0 %311, %v37_v9   ;;  %152 = vperm.xlu1 %312, %v38_v10   ;;  %p330_p2 = pnand %p328_p1, %p325_p0 }
  0x10   :  { %208 = vperm.xlu0 %311, %v39_v11   ;;  %213 = vperm.xlu1 %312, %v40_v12  }
  0x81   :  { %v54_v14 = vpop.permute.xlu1 %53 }
  0x83   :  { %v44_v15 = vpop.permute.xlu0 %43 }
  0x87   :  { %v59_v19 = vpop.permute.xlu1 %58  ;;  %v49_v22 = vpop.permute.xlu0 %48 }
  0x8b   :  { %v148_v33 = vpop.permute.xlu0 %147  ;;  %v153_v34 = vpop.permute.xlu1 %152 }
  0x8f   :  { %v209_v43 = vpop.permute.xlu0 %208  ;;  %v214_v44 = vpop.permute.xlu1 %213 }
  0xdd   :  { %v295_v16 = vpop.f32.mrb[0].mxu0 }
  0xde   :  { %v133_v17 = vadd.f32 %v295_v16, %v54_v14  ;;  %v124_v18 = vpop.f32.mrb[1].mxu0 }
  0xdf   :  { %v125_v20 = vadd.f32 %v124_v18, %v44_v15  ;;  %v296_v21 = vpop.f32.mrb[2].mxu0 }
  0xe0   :  { %v136_v23 = vadd.f32 %v296_v21, %v59_v19  ;;  %v127_v24 = vpop.f32.mrb[3].mxu0  ;;  %v141_v26 = vmax.f32 %v133_v17, 0.0 }
  0xe1   :  { %v128_v25 = vadd.f32 %v127_v24, %v49_v22  ;;  %v139_v28 = vmax.f32 %v125_v20, 0.0 }
  0xe2   :  { %v142_v27 = vmax.f32 %v136_v23, 0.0 }
  0xe3   :  { %v140_v29 = vmax.f32 %v128_v25, 0.0 }
  0xe4   :  { %v144_v30 = vpack.c.bf16 %v142_v27, %v141_v26 }
  0xe5   :  { %v143_v31 = vpack.c.bf16 %v140_v29, %v139_v28 }
  0xe7   :  { %298 = vmatpush3.bf16.msra.mxu1 %v143_v31 }
  0xe8   :  { %299 = vmatprep.subr.bf16.mxu1 %v337_v13 }
  0xeb   :  { %300 = vmatpush3.bf16.msra.mxu1 %v144_v30 }
  0xee   :  { %302 = vmatmul.mubr.msk.bf16.vlgmr.msra.gmra.mrb[0].mxu1 %vm83_vm0, %v317_v32 }
 0x1c1   :  { %v197_v35 = vpop.f32.mrb[0].mxu1 }
 0x1c2   :  { %v198_v36 = vadd.f32 %v197_v35, %v148_v33  ;;  %v303_v37 = vpop.f32.mrb[1].mxu1 }
 0x1c3   :  { %v200_v38 = vpop.f32.mrb[2].mxu1 }
 0x1c4   :  { %v204_v39 = vmax.f32 %v198_v36, 0.0  ;;  %v201_v40 = vadd.f32 %v200_v38, %v153_v34  ;;  %v304_v41 = vpop.f32.mrb[3].mxu1 }
 0x1c6   :  { %v205_v42 = vmax.f32 %v201_v40, 0.0  ;;  %v216_v45 = vmul.f32 %v209_v43, %v204_v39 }
 0x1c8   :  { %v217_v46 = vmul.f32 %v214_v44, %v205_v42 }
 0x1ca   :  { %v218_v47 = vadd.f32 %v217_v46, %v216_v45 }
 0x1cc   :  { %v219_v48 = vrot.slane %v218_v47, 4 }
 0x1ce   :  { %v220_v49 = vadd.f32 %v219_v48, %v218_v47 }
 0x1d0   :  { %v221_v50 = vrot.slane %v220_v49, 2 }
 0x1d2   :  { %v222_v51 = vadd.f32 %v221_v50, %v220_v49 }
 0x1d4   :  { %v223_v53 = vrot.slane %v222_v51, 1 }
 0x1d6   :  { %v224_v55 = vadd.f32 %v223_v53, %v222_v51 }
 0x1d8   :  { %v227_v57 = vadd.f32 %v226_v54, %v224_v55 }
 0x1da   :  { %v230_v58 = vmul.f32 %v229_v56, %v227_v57 }
 0x1dc   :  { %v231_v59 = vand.u32 2147483647, %v230_v58  ;;  %vm240_vm2 = vcmp.ge.f32.partialorder %v230_v58, 0.0  ;;  %v236_v5 = vmax.f32 %v230_v58, 0.0 }
 0x1de   :  { %v232_v60 = vsub.f32 0.0, %v231_v59 }
 0x1e0   :  { %v233_v61 = vmul.f32 1.442695, %v232_v60 }
 0x1e2   :  { %318 = vpow2.f32 %v233_v61 }
 0x1ec   :  { %v319_v62 = vpop.eup %318 }
 0x1ed   :  { %v235_v63 = vadd.f32 1.0, %v319_v62  ;;  %v241_v2 = vsel %vm240_vm2, %v319_v62, 1.0 }
 0x1ef   :  { %320 = vlog2.f32 %v235_v63 }
 0x1f0   :  { %322 = vrcp.f32 %v235_v63 }
 0x1f9   :  { %v321_v0 = vpop.eup %320 }
 0x1fa   :  { %v323_v1 = vpop.eup %322  ;;  %v238_v3 = vmul.f32 0.6931472, %v321_v0 }
 0x1fb   :  { %v243_v4 = vmul.f32 %v323_v1, %v241_v2 }
 0x1fc   :  { %v239_v7 = vadd.f32 %v238_v3, %v236_v5 }
 0x1fd   :  { %v244_v6 = vsub.f32 1.0, %v243_v4 }
 0x1ff   :  { %v245_v8 = vmul.f32 %v244_v6, %v244_v6 }
 0x201   :  { %v246_v9 = vmul.f32 %v245_v8, %v239_v7 }
 0x203   :  { %v248_v10 = vsel %vm247_vm3, %v246_v9, 0.0 }
 0x204   :  { %249 = vadd.xlane.f32.xlu0 %v248_v10 }
 0x291   :  { %v250_v11 = vpop.xlane.xlu0 %249 }
 0x292   :  { %v251_v12 = vrot.slane %v250_v11, 4 }
 0x294   :  { %v252_v13 = vadd.f32 %v251_v12, %v250_v11 }
 0x296   :  { %v253_v14 = vrot.slane %v252_v13, 2 }
 0x298   :  { %v254_v15 = vadd.f32 %v253_v14, %v252_v13 }
 0x29a   :  { %v255_v16 = vrot.slane %v254_v15, 1 }
 0x29c   :  { %v256_v17 = vadd.f32 %v255_v16, %v254_v15 }
 0x29e   :  { %305 = vpush %v256_v17 }
 0x2cf   :  { %s306_s1 = spop %305 }
 0x2d0   :  { %s258_s4 = smul.f32 0.001953125, %s306_s1 }
 0x2d2   :  { %260 = sst [smem:[#allocation3]] %s258_s4 }
 0x2d3   :  { %333 = shalt.err (!%p330_p2)
}
 0x2d4   :  { %s339_s27 = smov [#allocation3]  }
 0x2d5   :  { %268 = dma.smem_to_hbm %s339_s27, 16, %s435_s5, [#allocation4]  }
 0x2d6   :  { %334 = dma.done.wait [#allocation4], 16  }
 0x2d7   :  { %335 = vsyncadd [#allocation4], 4294967280 }
 0x2d8   :  { %272 = sfence }
 0x2d9   :  { %273 = vsyncpa [#allocation4], 1 }

</bundles_post_ra>
